<compile_context>
chip_gen: v7x
topology: tpu7x:2x2x1
jax: 0.10.0
libtpu: 0.0.40
codegen_flags: <defaults>
</compile_context>

<pallas_src>
import functools

import jax
import jax.numpy as jnp
from jax.experimental import pallas as pl
from jax.experimental.pallas import tpu as pltpu


_ROW_PAD_LABEL = -2147483647   # sentinel labels; assume real labels never
_COL_PAD_LABEL = -2147483646   # equal these (class indices are >= 0).
_PAD_SQ = 3e38                 # huge-but-finite squared norm for padded cols.


def _round_up(x, m):
    return ((x + m - 1) // m) * m


def _tpu_generation():
    try:
        kind = jax.devices()[0].device_kind.lower()
    except Exception:
        return "unknown"
    if "v5 lite" in kind or "v5e" in kind or "v5lite" in kind:
        return "v5e"
    if "v6" in kind:
        return "v6e"
    if "7" in kind:
        return "v7x"
    return "unknown"


def _pick_tiles(n, gen):
    """Pick (tile_m, tile_n) minimizing padding waste, generation-aware."""
    if n <= 128:
        t = _round_up(n, 16)          # single tile; 16-aligned for bf16 packing
        return t, t
    cands = [128] if gen == "v5e" else [128, 256]
    best_t, best_pad = None, None
    for t in cands:
        pad = _round_up(n, t)
        if gen == "v7x" and pad // t < 2:
            continue                   # keep both v7x TensorCores busy
        if best_pad is None or pad < best_pad or (pad == best_pad and t > best_t):
            best_pad, best_t = pad, t
    if best_t is None:
        best_t = 128
    tile_m = tile_n = best_t
    # Once the Gram runs in bf16 the kernel tends to go HBM-bound for large N;
    # a larger resident row tile cuts re-streaming of the column tiles.
    if gen != "v5e" and n >= 2048:
        tile_m = 512
    return tile_m, tile_n


def _triplet_kernel(x_row_ref, x_col_ref, sq_row_ref, sq_col_ref,
                    t_row_ref, t_col_ref, hinge_ref, ap_acc, an_acc, *,
                    margin):
    # x_row_ref: (tm, D)  bf16  row tile (resident across j)
    # x_col_ref: (tn, D)  bf16  column tile (streams over j)
    # sq_row_ref:(1, tm)  f32   exact squared norms of the row tile
    # sq_col_ref:(tn, 1)  f32   squared norms of the column tile (3e38 for pads)
    # t_row_ref: (1, tm)  i32   labels of the row tile (sentinel for pads)
    # t_col_ref: (tn, 1)  i32   labels of the column tile (sentinel for pads)
    # hinge_ref: (1, tm)  f32   per-row hinge output (written at last j)
    # ap_acc/an_acc: (1, tm) f32 VMEM scratch (running hardest pos/neg, in d^2)
    j = pl.program_id(1)

    @pl.when(j == 0)
    def _init():
        ap_acc[...] = jnp.full(ap_acc.shape, -jnp.inf, jnp.float32)
        an_acc[...] = jnp.full(an_acc.shape, jnp.inf, jnp.float32)

    # Gram tile in column-major orientation: g[c, r] = <x_col[c], x_row[r]>.
    # bf16 x bf16 -> f32 on the MXU (single pass); the row index lands on the
    # lane axis so the per-row reduction result is already a (1, tm) row.
    g = jax.lax.dot_general(
        x_col_ref[...], x_row_ref[...],
        dimension_numbers=(((1,), (1,)), ((), ())),
        preferred_element_type=jnp.float32)                       # (tn, tm)

    # Squared distance minus the row norm (monotone in j for a fixed row r):
    #   d2[r, c] = sq_r + (sq_c - 2 g[c, r]);  sq_r is added after the reduce.
    body = sq_col_ref[...] - 2.0 * g                              # (tn, tm)

    # Padded columns carry a sentinel label (never equal to a real label nor
    # the row-pad sentinel) and sq_col = 3e38, so they automatically lose the
    # pos-max and the neg-min -- no validity mask input needed.
    same = t_col_ref[...] == t_row_ref[...]                       # (tn, tm)

    tile_ap = jnp.max(jnp.where(same, body, -jnp.inf), axis=0, keepdims=True)
    tile_an = jnp.min(jnp.where(same, jnp.inf, body), axis=0, keepdims=True)
    ap_acc[...] = jnp.maximum(ap_acc[...], tile_ap)
    an_acc[...] = jnp.minimum(an_acc[...], tile_an)

    @pl.when(j == pl.num_programs(1) - 1)
    def _finalize():
        sq_r = sq_row_ref[...]                                    # (1, tm)
        # clamp + sqrt only on the reduced vectors (monotone -> same arg-max/min)
        d_ap = jnp.sqrt(jnp.maximum(ap_acc[...] + sq_r, 1e-12))
        d_an = jnp.sqrt(jnp.maximum(an_acc[...] + sq_r, 1e-12))
        hinge_ref[...] = jnp.maximum(d_ap - d_an + margin, 0.0)


def triplet_loss(inputs, targets, margin=0.6, tile_m=None, tile_n=None,
                 gram_dtype=jnp.bfloat16):
    """Batch-hard triplet loss.  inputs: (N, D) float, targets: (N,) int."""
    n, d = inputs.shape
    x32 = inputs.astype(jnp.float32)
    t = targets.astype(jnp.int32)

    gen = _tpu_generation()
    tm_def, tn_def = _pick_tiles(n, gen)
    tile_m = tile_m if tile_m is not None else tm_def
    tile_n = tile_n if tile_n is not None else tn_def

    # Rows and columns padded independently to their own tile (no lcm blowup).
    n_pad_m = _round_up(n, tile_m)
    n_pad_n = _round_up(n, tile_n)
    n_big = max(n_pad_m, n_pad_n)
    d_pad = _round_up(d, 128)   # lane-dense feature dim

    x_pad32 = jnp.zeros((n_big, d_pad), jnp.float32).at[:n, :d].set(x32)
    sq = jnp.sum(x_pad32 * x_pad32, axis=1)          # exact f32 norms, 0 for pads

    # bf16 operands for the Gram; norms / accumulation / hinge stay f32.
    x_g = x_pad32.astype(gram_dtype)
    x_row = x_g[:n_pad_m]
    x_col = x_g[:n_pad_n]

    sq_row = sq[:n_pad_m].reshape(1, n_pad_m)
    sq_col = (jnp.full((n_pad_n,), _PAD_SQ, jnp.float32)
              .at[:n].set(sq[:n]).reshape(n_pad_n, 1))
    t_row = (jnp.full((n_pad_m,), _ROW_PAD_LABEL, jnp.int32)
             .at[:n].set(t).reshape(1, n_pad_m))
    t_col = (jnp.full((n_pad_n,), _COL_PAD_LABEL, jnp.int32)
             .at[:n].set(t).reshape(n_pad_n, 1))

    grid = (n_pad_m // tile_m, n_pad_n // tile_n)

    # Scoped-VMEM budget: double-buffered row+col tiles + (tn, tm) temps.
    itemsize = jnp.dtype(gram_dtype).itemsize
    tile_bytes = (2 * tile_m * d_pad * itemsize      # row tile, double-buffered
                  + 2 * tile_n * d_pad * itemsize    # col tile, double-buffered
                  + 6 * tile_n * tile_m * 4          # gram / body / select temps
                  + 16 * tile_m * 4)                 # accumulators + vectors
    vmem_cap = (60 << 20) if gen == "v7x" else (100 << 20)
    vmem_limit = min(max(int(tile_bytes * 1.5) + (1 << 20), 32 << 20), vmem_cap)

    cost = pl.CostEstimate(
        flops=2 * n_pad_m * n_pad_n * d_pad,
        transcendentals=2 * n_pad_m,
        bytes_accessed=((n_pad_m // tile_m) * n_pad_n * d_pad * itemsize
                        + n_pad_m * d_pad * itemsize
                        + (n_pad_m + n_pad_n) * 8
                        + n_pad_m * 4))

    grid_spec = pltpu.PrefetchScalarGridSpec(
        num_scalar_prefetch=0,
        grid=grid,
        in_specs=[
            pl.BlockSpec((tile_m, d_pad), lambda i, j: (i, 0)),   # x row tile
            pl.BlockSpec((tile_n, d_pad), lambda i, j: (j, 0)),   # x col tile
            pl.BlockSpec((1, tile_m),     lambda i, j: (0, i)),   # sq rows
            pl.BlockSpec((tile_n, 1),     lambda i, j: (j, 0)),   # sq cols
            pl.BlockSpec((1, tile_m),     lambda i, j: (0, i)),   # labels rows
            pl.BlockSpec((tile_n, 1),     lambda i, j: (j, 0)),   # labels cols
        ],
        out_specs=pl.BlockSpec((1, tile_m), lambda i, j: (0, i)),  # lane-dense
        scratch_shapes=[pltpu.VMEM((1, tile_m), jnp.float32),      # dist_ap^2
                        pltpu.VMEM((1, tile_m), jnp.float32)],     # dist_an^2
    )

    hinge = pl.pallas_call(
        functools.partial(_triplet_kernel, margin=margin),
        out_shape=jax.ShapeDtypeStruct((1, n_pad_m), jnp.float32),
        grid_spec=grid_spec,
        compiler_params=pltpu.CompilerParams(
            dimension_semantics=("parallel", "arbitrary"),
            vmem_limit_bytes=vmem_limit),
        cost_estimate=cost,
    )(x_row, x_col, sq_row, sq_col, t_row, t_col)

    # Mean over the true batch (padded rows sliced off).
    return jnp.sum(hinge[0, :n]) / n


def _reference_loss(x, y, margin=0.6, gram_dtype=jnp.float32):
    """Pure-JAX reference; gram_dtype=bfloat16 mirrors the kernel's MXU path."""
    x32 = x.astype(jnp.float32)
    sq = jnp.sum(x32 * x32, axis=1, keepdims=True)
    xg = x32.astype(gram_dtype)
    g = jnp.dot(xg, xg.T, preferred_element_type=jnp.float32)
    dist = jnp.sqrt(jnp.maximum(sq + sq.T - 2.0 * g, 1e-12))
    mask = y[:, None] == y[None, :]
    d_ap = jnp.max(jnp.where(mask, dist, -jnp.inf), axis=1)
    d_an = jnp.min(jnp.where(mask, jnp.inf, dist), axis=1)
    return jnp.mean(jnp.maximum(d_ap - d_an + margin, 0.0))


if __name__ == "__main__":
    key = jax.random.PRNGKey(0)
    k1, k2 = jax.random.split(key)

    # Case 1: tiny demo (single tile, single grid step).
    n1, d1 = 8, 32
    x1 = jax.random.normal(k1, (n1, d1), dtype=jnp.float32)
    y1 = jnp.array([0, 0, 1, 1, 2, 2, 3, 3], dtype=jnp.int32)
    loss1 = triplet_loss(x1, y1)
    jax.block_until_ready(loss1)
    ref1_bf = _reference_loss(x1, y1, gram_dtype=jnp.bfloat16)
    ref1_f32 = _reference_loss(x1, y1)
    assert jnp.allclose(loss1, ref1_bf, atol=1e-3, rtol=1e-3), (loss1, ref1_bf)
    assert jnp.allclose(loss1, ref1_f32, atol=5e-2, rtol=2e-2), (loss1, ref1_f32)

    # Case 2: exercises the tiled grid (2x2 blocks), N/D padding, the padded
    # column sentinels and the flash-style running max/min accumulators.
    n2, d2 = 200, 72
    x2 = jax.random.normal(k2, (n2, d2), dtype=jnp.float32)
    y2 = (jnp.arange(n2) % 10).astype(jnp.int32)   # every class has >= 2 members
    loss2 = triplet_loss(x2, y2, tile_m=128, tile_n=128)
    jax.block_until_ready(loss2)
    ref2_bf = _reference_loss(x2, y2, gram_dtype=jnp.bfloat16)
    ref2_f32 = _reference_loss(x2, y2)
    assert jnp.allclose(loss2, ref2_bf, atol=1e-3, rtol=1e-3), (loss2, ref2_bf)
    assert jnp.allclose(loss2, ref2_f32, atol=5e-2, rtol=2e-2), (loss2, ref2_f32)

    print("KERNEL_OK")
</pallas_src>

<mosaic_0001>
module attributes {stable_mosaic.version = 11 : i64} {
  func.func @_triplet_kernel(%arg0: i32, %arg1: i32, %arg2: memref<16x128xbf16, #tpu.memory_space<vmem>>, %arg3: memref<16x128xbf16, #tpu.memory_space<vmem>>, %arg4: memref<1x16xf32, #tpu.memory_space<vmem>>, %arg5: memref<16x1xf32, #tpu.memory_space<vmem>>, %arg6: memref<1x16xi32, #tpu.memory_space<vmem>>, %arg7: memref<16x1xi32, #tpu.memory_space<vmem>>, %arg8: memref<1x16xf32, #tpu.memory_space<vmem>>, %arg9: memref<1x16xf32, #tpu.memory_space<vmem>>, %arg10: memref<1x16xf32, #tpu.memory_space<vmem>>) attributes {dimension_semantics = [#tpu.dimension_semantics<parallel>, #tpu.dimension_semantics<arbitrary>], iteration_bounds = array<i64: 1, 1>, scalar_prefetch = 0 : i64, scratch_operands = 2 : i64, tpu.core_type = #tpu.core_type<tc>, window_params = [{transform_indices = @transform_0, window_bounds = array<i64: 16, 128>}, {transform_indices = @transform_1, window_bounds = array<i64: 16, 128>}, {transform_indices = @transform_2, window_bounds = array<i64: 1, 16>}, {transform_indices = @transform_3, window_bounds = array<i64: 16, 1>}, {transform_indices = @transform_4, window_bounds = array<i64: 1, 16>}, {transform_indices = @transform_5, window_bounds = array<i64: 16, 1>}, {transform_indices = @transform_6, window_bounds = array<i64: 1, 16>}]} {
    %c0_i32 = arith.constant 0 : i32
    %0 = arith.cmpi eq, %arg1, %c0_i32 : i32
    %1 = arith.extui %0 : i1 to i32
    %c0_i32_0 = arith.constant 0 : i32
    %2 = arith.cmpi ne, %1, %c0_i32_0 : i32
    scf.if %2 {
      %cst_25 = arith.constant 0xFF800000 : f32
      %33 = vector.broadcast %cst_25 : f32 to vector<1x16xf32>
      %c0_26 = arith.constant 0 : index
      %c0_27 = arith.constant 0 : index
      %34 = vector.load %arg9[%c0_26, %c0_27] : memref<1x16xf32, #tpu.memory_space<vmem>>, vector<1x16xf32>
      tpu.vector_store %arg9[%c0_26, %c0_27], %33 {strides = array<i32>} : memref<1x16xf32, #tpu.memory_space<vmem>>, vector<1x16xf32>,
      %cst_28 = arith.constant 0x7F800000 : f32
      %35 = vector.broadcast %cst_28 : f32 to vector<1x16xf32>
      %c0_29 = arith.constant 0 : index
      %c0_30 = arith.constant 0 : index
      %36 = vector.load %arg10[%c0_29, %c0_30] : memref<1x16xf32, #tpu.memory_space<vmem>>, vector<1x16xf32>
      tpu.vector_store %arg10[%c0_29, %c0_30], %35 {strides = array<i32>} : memref<1x16xf32, #tpu.memory_space<vmem>>, vector<1x16xf32>,
    } else {
    }
    %c0 = arith.constant 0 : index
    %c0_1 = arith.constant 0 : index
    %3 = vector.load %arg3[%c0, %c0_1] : memref<16x128xbf16, #tpu.memory_space<vmem>>, vector<16x128xbf16>
    %c0_2 = arith.constant 0 : index
    %c0_3 = arith.constant 0 : index
    %4 = vector.load %arg2[%c0_2, %c0_3] : memref<16x128xbf16, #tpu.memory_space<vmem>>, vector<16x128xbf16>
    %cst = arith.constant dense<0.000000e+00> : vector<16x16xf32>
    %5 = tpu.matmul %3, %4, %cst {dimension_numbers = #tpu.dot_dimension_numbers<[1], [1], [0], [0], [0, 0, 1, 0], [], []>} : vector<16x128xbf16>, vector<16x128xbf16>, vector<16x16xf32> -> vector<16x16xf32>
    %c0_4 = arith.constant 0 : index
    %c0_5 = arith.constant 0 : index
    %6 = vector.load %arg5[%c0_4, %c0_5] : memref<16x1xf32, #tpu.memory_space<vmem>>, vector<16x1xf32>
    %cst_6 = arith.constant 2.000000e+00 : f32
    %7 = vector.broadcast %cst_6 : f32 to vector<16x16xf32>
    %8 = arith.mulf %7, %5 : vector<16x16xf32>
    %9 = vector.broadcast %6 : vector<16x1xf32> to vector<16x16xf32>
    %10 = arith.subf %9, %8 : vector<16x16xf32>
    %c0_7 = arith.constant 0 : index
    %c0_8 = arith.constant 0 : index
    %11 = vector.load %arg7[%c0_7, %c0_8] : memref<16x1xi32, #tpu.memory_space<vmem>>, vector<16x1xi32>
    %c0_9 = arith.constant 0 : index
    %c0_10 = arith.constant 0 : index
    %12 = vector.load %arg6[%c0_9, %c0_10] : memref<1x16xi32, #tpu.memory_space<vmem>>, vector<1x16xi32>
    %13 = vector.broadcast %11 : vector<16x1xi32> to vector<16x16xi32>
    %14 = vector.broadcast %12 : vector<1x16xi32> to vector<16x16xi32>
    %15 = arith.cmpi eq, %13, %14 : vector<16x16xi32>
    %cst_11 = arith.constant 0xFF800000 : f32
    %16 = vector.broadcast %cst_11 : f32 to vector<16x16xf32>
    %17 = arith.select %15, %10, %16 : vector<16x16xi1>, vector<16x16xf32>
    %cst_12 = arith.constant dense<0xFF800000> : vector<16xf32>
    %18 = vector.multi_reduction <maximumf>, %17, %cst_12 [0] : vector<16x16xf32> to vector<16xf32>
    %19 = vector.shape_cast %18 : vector<16xf32> to vector<1x16xf32>
    %cst_13 = arith.constant 0x7F800000 : f32
    %20 = vector.broadcast %cst_13 : f32 to vector<16x16xf32>
    %21 = arith.select %15, %20, %10 : vector<16x16xi1>, vector<16x16xf32>
    %cst_14 = arith.constant dense<0x7F800000> : vector<16xf32>
    %22 = vector.multi_reduction <minimumf>, %21, %cst_14 [0] : vector<16x16xf32> to vector<16xf32>
    %23 = vector.shape_cast %22 : vector<16xf32> to vector<1x16xf32>
    %c0_15 = arith.constant 0 : index
    %c0_16 = arith.constant 0 : index
    %24 = vector.load %arg9[%c0_15, %c0_16] : memref<1x16xf32, #tpu.memory_space<vmem>>, vector<1x16xf32>
    %25 = arith.maximumf %24, %19 : vector<1x16xf32>
    %c0_17 = arith.constant 0 : index
    %c0_18 = arith.constant 0 : index
    %26 = vector.load %arg9[%c0_17, %c0_18] : memref<1x16xf32, #tpu.memory_space<vmem>>, vector<1x16xf32>
    tpu.vector_store %arg9[%c0_17, %c0_18], %25 {strides = array<i32>} : memref<1x16xf32, #tpu.memory_space<vmem>>, vector<1x16xf32>,
    %c0_19 = arith.constant 0 : index
    %c0_20 = arith.constant 0 : index
    %27 = vector.load %arg10[%c0_19, %c0_20] : memref<1x16xf32, #tpu.memory_space<vmem>>, vector<1x16xf32>
    %28 = arith.minimumf %27, %23 : vector<1x16xf32>
    %c0_21 = arith.constant 0 : index
    %c0_22 = arith.constant 0 : index
    %29 = vector.load %arg10[%c0_21, %c0_22] : memref<1x16xf32, #tpu.memory_space<vmem>>, vector<1x16xf32>
    tpu.vector_store %arg10[%c0_21, %c0_22], %28 {strides = array<i32>} : memref<1x16xf32, #tpu.memory_space<vmem>>, vector<1x16xf32>,
    %c0_i32_23 = arith.constant 0 : i32
    %30 = arith.cmpi eq, %arg1, %c0_i32_23 : i32
    %31 = arith.extui %30 : i1 to i32
    %c0_i32_24 = arith.constant 0 : i32
    %32 = arith.cmpi ne, %31, %c0_i32_24 : i32
    scf.if %32 {
      %c0_25 = arith.constant 0 : index
      %c0_26 = arith.constant 0 : index
      %33 = vector.load %arg4[%c0_25, %c0_26] : memref<1x16xf32, #tpu.memory_space<vmem>>, vector<1x16xf32>
      %c0_27 = arith.constant 0 : index
      %c0_28 = arith.constant 0 : index
      %34 = vector.load %arg9[%c0_27, %c0_28] : memref<1x16xf32, #tpu.memory_space<vmem>>, vector<1x16xf32>
      %35 = arith.addf %34, %33 : vector<1x16xf32>
      %cst_29 = arith.constant 9.99999996E-13 : f32
      %36 = vector.broadcast %cst_29 : f32 to vector<1x16xf32>
      %37 = arith.maximumf %35, %36 : vector<1x16xf32>
      %38 = math.sqrt %37 : vector<1x16xf32>
      %c0_30 = arith.constant 0 : index
      %c0_31 = arith.constant 0 : index
      %39 = vector.load %arg10[%c0_30, %c0_31] : memref<1x16xf32, #tpu.memory_space<vmem>>, vector<1x16xf32>
      %40 = arith.addf %39, %33 : vector<1x16xf32>
      %cst_32 = arith.constant 9.99999996E-13 : f32
      %41 = vector.broadcast %cst_32 : f32 to vector<1x16xf32>
      %42 = arith.maximumf %40, %41 : vector<1x16xf32>
      %43 = math.sqrt %42 : vector<1x16xf32>
      %44 = arith.subf %38, %43 : vector<1x16xf32>
      %cst_33 = arith.constant 6.000000e-01 : f32
      %45 = vector.broadcast %cst_33 : f32 to vector<1x16xf32>
      %46 = arith.addf %44, %45 : vector<1x16xf32>
      %cst_34 = arith.constant 0.000000e+00 : f32
      %47 = vector.broadcast %cst_34 : f32 to vector<1x16xf32>
      %48 = arith.maximumf %46, %47 : vector<1x16xf32>
      %c0_35 = arith.constant 0 : index
      %c0_36 = arith.constant 0 : index
      %49 = vector.load %arg8[%c0_35, %c0_36] : memref<1x16xf32, #tpu.memory_space<vmem>>, vector<1x16xf32>
      tpu.vector_store %arg8[%c0_35, %c0_36], %48 {strides = array<i32>} : memref<1x16xf32, #tpu.memory_space<vmem>>, vector<1x16xf32>,
    } else {
    }
    return
  }
  func.func @transform_0(%arg0: i32, %arg1: i32) -> (i32, i32) {
    %c0_i32 = arith.constant 0 : i32
    %c0_i32_0 = arith.constant 0 : i32
    return %arg0, %c0_i32 : i32, i32
  }
  func.func @transform_1(%arg0: i32, %arg1: i32) -> (i32, i32) {
    %c0_i32 = arith.constant 0 : i32
    %c0_i32_0 = arith.constant 0 : i32
    return %arg1, %c0_i32 : i32, i32
  }
  func.func @transform_2(%arg0: i32, %arg1: i32) -> (i32, i32) {
    %c0_i32 = arith.constant 0 : i32
    %c0_i32_0 = arith.constant 0 : i32
    return %c0_i32, %arg0 : i32, i32
  }
  func.func @transform_3(%arg0: i32, %arg1: i32) -> (i32, i32) {
    %c0_i32 = arith.constant 0 : i32
    %c0_i32_0 = arith.constant 0 : i32
    return %arg1, %c0_i32 : i32, i32
  }
  func.func @transform_4(%arg0: i32, %arg1: i32) -> (i32, i32) {
    %c0_i32 = arith.constant 0 : i32
    %c0_i32_0 = arith.constant 0 : i32
    return %c0_i32, %arg0 : i32, i32
  }
  func.func @transform_5(%arg0: i32, %arg1: i32) -> (i32, i32) {
    %c0_i32 = arith.constant 0 : i32
    %c0_i32_0 = arith.constant 0 : i32
    return %arg1, %c0_i32 : i32, i32
  }
  func.func @transform_6(%arg0: i32, %arg1: i32) -> (i32, i32) {
    %c0_i32 = arith.constant 0 : i32
    %c0_i32_0 = arith.constant 0 : i32
    return %c0_i32, %arg0 : i32, i32
  }
}

</mosaic_0001>

<bundles_post_ra>
// kernel: tpu_custom_call.1
= control target key start
LH: loop header
LB: loop body
LE: loop exit
PB: predicated region body
PF: predicated region fallthrough
CT: control target
= control target key end

     0   :  { %v241_v1 = vmov 0.0   ;;  %vm242_vm0 = vmmov 0   ;;  %v243_v4 = vmov 0   ;;  %s323_s0 = inlined_call_operand.vmem [shape: bf16[16,128], index: 0, kind: input, shape index: {}]   ;;  %s324_s1 = inlined_call_operand.vmem [shape: bf16[16,128], index: 1, kind: input, shape index: {}]   ;;  %s325_s2 = inlined_call_operand.vmem [shape: f32[1,16], index: 2, kind: input, shape index: {}]   ;;  %s326_s3 = inlined_call_operand.vmem [shape: f32[16,1], index: 3, kind: input, shape index: {}]   ;;  %s327_s4 = inlined_call_operand.vmem [shape: s32[1,16], index: 4, kind: input, shape index: {}]   ;;  %s328_s5 = inlined_call_operand.vmem [shape: s32[16,1], index: 5, kind: input, shape index: {}]   ;;  %s329_s6 = inlined_call_operand.hbm [shape: f32[1,16], index: 6, kind: output, shape index: {}]  }
   0x1   :  { %v211_v0 = vld [vmem:[%s323_s0] sm:$0xff]   ;;  %197 = vmatprep.subr.bf16.mxu0 %v241_v1  ;;  %199 = vmatprep.mubr.msk.bf16.mxu0 %vm242_vm0, %v241_v1 }
   0x2   :  { %198 = vmatpush3.bf16.xpose.msra.mxu0 %v211_v0  ;;  %v89_v2 = vld [vmem:[%s326_s3] sm:$0xff]  ;;  %209 = vset.pattern.permute.xlu0 %v243_v4 }
   0x3   :  { %v105_v3 = vld [vmem:[%s328_s5] sm:$0xff]  ;;  %210 = vset.pattern.permute.xlu1 %v243_v4 }
   0x4   :  { %11 = vsyncpa [#allocation5], 0  ;;  %95 = vperm.xlu0 %209, %v89_v2   ;;  %109 = vperm.xlu1 %210, %v105_v3   ;;  %v212_v5 = vld [vmem:[%s324_s1] sm:$0xff]   ;;  %v90_v6 = vld [vmem:[%s326_s3 + $0x8] sm:$0xff]  ;;  %vm29_vm1 = vcmask 122880   ;;  %v244_v8 = vmov -inf  }
   0x5   :  { %v106_v7 = vld [vmem:[%s328_s5 + $0x8] sm:$0xff]  ;;  %30 = vst.msk [vmem:[#allocation2] sm:$0x1] %vm29_vm1, %v244_v8  ;;  %v245_v9 = vmov inf   ;;  %v194_v13 = vld [vmem:[%s327_s4] ss:$0 sm:$0xff] }
   0x6   :  { %31 = vst.msk [vmem:[#allocation3] sm:$0x1] %vm29_vm1, %v245_v9  ;;  %vm122_vm3 = vcmask 130048   ;;  %v153_v49 = vld [vmem:[%s325_s2] sm:$0x1]  ;;  %s246_s2 = smov [#allocation4]  }
   0x7   :  { %s184_s5 = sshll.u32 %s246_s2, 4  ;;  %s185_s5 = int_to_ptr.vmem [resolvable:$true] %s184_s5 }
   0x8   :  { %100 = vperm.xlu0 %209, %v90_v6   ;;  %112 = vperm.xlu1 %210, %v106_v7   ;;  %s217_s9 = scalar_lea.vmem %s185_s5, 16  ;;  %s221_s10 = scalar_lea.vmem %s185_s5, 32 }
   0x9   :  { %200 = vmatmul.mubr.bf16.vlgmr.msra.gmra.mrb[0].mxu0 %v212_v5  ;;  %p218_p0 = scmp.ne.s32.totalorder %s185_s5, %s217_s9  ;;  %p222_p1 = scmp.lt.s32.totalorder %s185_s5, %s185_s5 }
   0xa   :  { %p223_p2 = scmp.lt.s32.totalorder %s221_s10, %s217_s9 }
   0xc   :  { %v143_v43 = vld [vmem:[#allocation2] sm:$0x1]  ;;  %p224_p3 = por %p223_p2, %p222_p1 }
   0xd   :  { %v147_v44 = vld [vmem:[#allocation3] sm:$0x1] }
   0xe   :  { %p225_p4 = pnand %p224_p3, %p218_p0 }
  0x83   :  { %v110_v10 = vpop.permute.xlu1 %109  ;;  %v96_v11 = vpop.permute.xlu0 %95 }
  0x84   :  { %vm118_vm2 = vcmp.eq.s32.totalorder %v110_v10, %v194_v13 }
  0x87   :  { %v113_v18 = vpop.permute.xlu1 %112  ;;  %v101_v21 = vpop.permute.xlu0 %100 }
  0x88   :  { %vm119_vm4 = vcmp.eq.s32.totalorder %v113_v18, %v194_v13 }
  0xdc   :  { %v82_v12 = vpop.f32.mrb[0].mxu0 }
  0xdd   :  { %v91_v14 = vmul.f32 2.0, %v82_v12  ;;  %v201_v15 = vpop.f32.mrb[1].mxu0 }
  0xde   :  { %v85_v16 = vpop.f32.mrb[2].mxu0 }
  0xdf   :  { %v103_v17 = vsub.f32 %v96_v11, %v91_v14  ;;  %v92_v19 = vmul.f32 2.0, %v85_v16  ;;  %v202_v20 = vpop.f32.mrb[3].mxu0 }
  0xe1   :  { %v120_v22 = vsel %vm118_vm2, %v103_v17, -inf  ;;  %v132_v23 = vsel %vm118_vm2, inf, %v103_v17  ;;  %v104_v24 = vsub.f32 %v101_v21, %v92_v19 }
  0xe2   :  { %v123_v27 = vsel %vm122_vm3, %v120_v22, -inf  ;;  %v134_v28 = vsel %vm122_vm3, %v132_v23, inf }
  0xe3   :  { %v121_v25 = vsel %vm119_vm4, %v104_v24, -inf  ;;  %v133_v26 = vsel %vm119_vm4, inf, %v104_v24 }
  0xe4   :  { %v124_v29 = vsel %vm122_vm3, %v121_v25, -inf  ;;  %v135_v30 = vsel %vm122_vm3, %v133_v26, inf }
  0xe5   :  { %v125_v31 = vmax.f32 %v123_v27, %v124_v29  ;;  %v136_v32 = vmin.f32 %v134_v28, %v135_v30 }
  0xe7   :  { %v126_v33 = vrot.slane %v125_v31, 4  ;;  %v137_v34 = vrot.slane %v136_v32, 4 }
  0xe9   :  { %v127_v35 = vmax.f32 %v125_v31, %v126_v33  ;;  %v138_v36 = vmin.f32 %v136_v32, %v137_v34 }
  0xeb   :  { %v128_v37 = vrot.slane %v127_v35, 2  ;;  %v139_v38 = vrot.slane %v138_v36, 2 }
  0xed   :  { %v129_v39 = vmax.f32 %v127_v35, %v128_v37  ;;  %v140_v40 = vmin.f32 %v138_v36, %v139_v38 }
  0xef   :  { %v130_v41 = vrot.slane %v129_v39, 1  ;;  %v141_v42 = vrot.slane %v140_v40, 1 }
  0xf1   :  { %v131_v45 = vmax.f32 %v129_v39, %v130_v41  ;;  %v142_v46 = vmin.f32 %v140_v40, %v141_v42 }
  0xf3   :  { %v144_v47 = vmax.f32 %v143_v43, %v131_v45  ;;  %v148_v48 = vmin.f32 %v147_v44, %v142_v46 }
  0xf5   :  { %146 = vst.msk [vmem:[#allocation2] sm:$0x1] %vm29_vm1, %v144_v47  ;;  %149 = vst.msk [vmem:[#allocation3] sm:$0x1] %vm29_vm1, %v148_v48 }
  0xfc   :  { %v154_v50 = vld [vmem:[#allocation2] sm:$0x1]  ;;  %v164_v51 = vld [vmem:[#allocation3] sm:$0x1] }
  0xfd   :  { %v155_v52 = vadd.f32 %v154_v50, %v153_v49  ;;  %v165_v53 = vadd.f32 %v164_v51, %v153_v49 }
  0xff   :  { %v156_v54 = vmax.f32 %v155_v52, 1e-12  ;;  %v166_v55 = vmax.f32 %v165_v53, 1e-12 }
 0x101   :  { %213 = vrsqrt.f32 %v156_v54  ;;  %vm159_vm5 = vcmp.eq.f32.partialorder %v156_v54, inf  ;;  %v162_v59 = vand.u32 2147483648, %v156_v54  ;;  %vm161_vm6 = vcmp.eq.f32.partialorder %v156_v54, 0.0 }
 0x102   :  { %215 = vrsqrt.f32 %v166_v55  ;;  %vm169_vm7 = vcmp.eq.f32.partialorder %v166_v55, inf  ;;  %v172_v62 = vand.u32 2147483648, %v166_v55  ;;  %vm171_vm8 = vcmp.eq.f32.partialorder %v166_v55, 0.0 }
 0x10b   :  { %v214_v56 = vpop.eup %213 }
 0x10c   :  { %v216_v57 = vpop.eup %215  ;;  %v158_v58 = vmul.f32 %v214_v56, %v156_v54 }
 0x10d   :  { %v168_v60 = vmul.f32 %v216_v57, %v166_v55 }
 0x10e   :  { %v160_v61 = vsel %vm159_vm5, %v156_v54, %v158_v58 }
 0x10f   :  { %v163_v63 = vsel %vm161_vm6, %v162_v59, %v160_v61  ;;  %v170_v0 = vsel %vm169_vm7, %v166_v55, %v168_v60 }
 0x110   :  { %v173_v1 = vsel %vm171_vm8, %v172_v62, %v170_v0 }
 0x111   :  { %v174_v2 = vsub.f32 %v163_v63, %v173_v1 }
 0x113   :  { %v175_v3 = vadd.f32 0.6, %v174_v2 }
 0x115   :  { %v176_v4 = vmax.f32 %v175_v3, 0.0 }
 0x117   :  { %177 = vst.msk [vmem:[#allocation4] sm:$0x1] %vm29_vm1, %v176_v4 }
 0x118   :  { %228 = shalt.err (!%p225_p4)
}
 0x119   :  { %s229_s13 = scalar_lea.hbm %s329_s6, 16 }
 0x11a   :  { %p230_p5 = scmp.ne.s32.totalorder %s329_s6, %s229_s13  ;;  %p233_p6 = scmp.lt.u32.totalorder %s229_s13, %s329_s6 }
 0x11c   :  { %p235_p7 = pnand %p233_p6, %p230_p5 }
 0x11e   :  { %238 = shalt.err (!%p235_p7)
}
 0x11f   :  { %187 = dma.vmem_to_hbm [thread:$0]  %s185_s5, 16, %s329_s6, [#allocation5]  }
 0x120   :  { %239 = dma.done.wait [#allocation5], 16  }
 0x121   :  { %240 = vsyncadd [#allocation5], 4294967280 }
 0x122   :  { %191 = vsyncpa [#allocation5], 1 }

</bundles_post_ra>
